<compile_context>
chip_gen: v6e
topology: v6e:2x2x1
jax: 0.10.0
libtpu: 0.0.40
codegen_flags: <defaults>
</compile_context>

<pallas_src>
import jax
import jax.numpy as jnp
from jax.experimental import pallas as pl
from jax.experimental.pallas import tpu as pltpu


def _maskgate_kernel(x_ref, wog_ref, bog_ref, wm_ref, bm_ref, out_ref):
    """All refs in VMEM.

    x_ref   : (BN, C, TL)    BN batch elements, one L-tile
    wog_ref : (2*Cpad, C)    [w_out (padded) ; w_gate (padded)]
    bog_ref : (2*Cpad, 1)    [b_out (padded) ; b_gate (padded)]
    wm_ref  : (C, Cpad)      mask conv weight, input dim zero-padded
    bm_ref  : (C, 1)         mask conv bias
    out_ref : (BN, C, TL)
    """
    cpad = wog_ref.shape[0] // 2
    bn = x_ref.shape[0]
    for b in range(bn):                                      # static unroll
        x = x_ref[b]                                         # (C, TL)

        # Fused output + gate branches: one MXU matmul of 2*Cpad out channels.
        og = jnp.dot(wog_ref[...], x,
                     preferred_element_type=jnp.float32) + bog_ref[...]
        o = jnp.tanh(og[:cpad, :])                           # output branch
        # sigmoid via tanh identity: one EUP op instead of exp + reciprocal.
        g = 0.5 * (jnp.tanh(0.5 * og[cpad:, :]) + 1.0)       # gate branch
        m = (o * g).astype(wm_ref.dtype)                     # (Cpad, TL)

        # Mask branch: Conv1d(k=1) + ReLU.  Padded rows of m hit zero columns.
        y = jnp.dot(wm_ref[...], m,
                    preferred_element_type=jnp.float32) + bm_ref[...]
        out_ref[b] = jnp.maximum(y, 0.0).astype(out_ref.dtype)


def _choose_tiles(N, C, L, itemsize, target_bytes=2 << 20):
    """Pick (BN, TL) so each x tile is ~target_bytes and lane-dense."""
    if L < 128:
        # Small-L regime: batch several elements per grid step.
        bn = max(1, int(target_bytes // (itemsize * C * L)))
        return min(bn, N), L
    # Largest 128-multiple tile that does not spill past a ragged-free grid.
    max_tl = L if L % 128 == 0 else (L // 128) * 128
    tl = int(target_bytes // (itemsize * C)) // 128 * 128
    tl = max(tl, min(512, max_tl))
    tl = min(tl, max_tl)
    return 1, tl


def mask_gate(x, w_out, b_out, w_gate, b_gate, w_mask, b_mask):
    """x: (N, C, L); weights (C, C); biases (C,). Returns (N, C, L)."""
    N, C, L = x.shape
    dt = x.dtype
    itemsize = jnp.dtype(dt).itemsize
    BN, TL = _choose_tiles(N, C, L, itemsize)
    grid = (pl.cdiv(N, BN), pl.cdiv(L, TL))

    # Sublane-aligned stacking: pad each branch to Cpad = round_up(C, 8) rows
    # so the in-kernel split of the fused matmul output is a free view.
    Cpad = ((C + 7) // 8) * 8
    pad_r = Cpad - C

    def pad_rows(w):
        return jnp.pad(w, ((0, pad_r), (0, 0)))

    w_og = jnp.concatenate([pad_rows(w_out), pad_rows(w_gate)],
                           axis=0).astype(dt)                 # (2*Cpad, C)
    b_og = jnp.concatenate([jnp.pad(b_out, (0, pad_r)),
                            jnp.pad(b_gate, (0, pad_r))]
                           ).reshape(2 * Cpad, 1).astype(dt)  # (2*Cpad, 1)
    w_m = jnp.pad(w_mask, ((0, 0), (0, pad_r))).astype(dt)    # (C, Cpad)
    b_m = b_mask.reshape(C, 1).astype(dt)                     # (C, 1)

    flops = 2 * N * L * (2 * Cpad * C + C * Cpad)
    bytes_accessed = (2 * N * C * L) * itemsize + (w_og.size + w_m.size) * itemsize
    transcendentals = 2 * N * L * Cpad          # two tanh per element

    return pl.pallas_call(
        _maskgate_kernel,
        out_shape=jax.ShapeDtypeStruct((N, C, L), dt),
        grid=grid,
        in_specs=[
            pl.BlockSpec((BN, C, TL), lambda n, l: (n, 0, l)),   # x tile
            pl.BlockSpec((2 * Cpad, C), lambda n, l: (0, 0)),    # w_out;w_gate
            pl.BlockSpec((2 * Cpad, 1), lambda n, l: (0, 0)),    # b_out;b_gate
            pl.BlockSpec((C, Cpad), lambda n, l: (0, 0)),        # w_mask
            pl.BlockSpec((C, 1), lambda n, l: (0, 0)),           # b_mask
        ],
        out_specs=pl.BlockSpec((BN, C, TL), lambda n, l: (n, 0, l)),
        compiler_params=pltpu.CompilerParams(
            dimension_semantics=("parallel", "parallel"),
            # TL budgeting keeps the double-buffered footprint well under
            # 32 MiB, which fits every generation (incl. v7x's 64 MiB VMEM).
            vmem_limit_bytes=32 * 1024 * 1024),
        cost_estimate=pl.CostEstimate(
            flops=flops,
            bytes_accessed=bytes_accessed,
            transcendentals=transcendentals),
    )(x, w_og, b_og, w_m, b_m)


def _reference(x, w_out, b_out, w_gate, b_gate, w_mask, b_mask):
    """Pure-JAX reference replicating the PyTorch forward."""
    def conv1x1(z, w, b):
        # z: (N, C, L), w: (Cout, Cin), b: (Cout,)
        return jnp.einsum('oc,ncl->nol', w, z) + b[None, :, None]
    o = jnp.tanh(conv1x1(x, w_out, b_out))
    g = jax.nn.sigmoid(conv1x1(x, w_gate, b_gate))
    m = o * g
    return jnp.maximum(conv1x1(m, w_mask, b_mask), 0.0)


def _run_case(key, N, C, L):
    ks = jax.random.split(key, 7)
    bound = 1.0 / (C ** 0.5)
    x = jax.random.normal(ks[0], (N, C, L), dtype=jnp.float32)
    w_out = jax.random.uniform(ks[1], (C, C), minval=-bound, maxval=bound)
    b_out = jax.random.uniform(ks[2], (C,), minval=-bound, maxval=bound)
    w_gate = jax.random.uniform(ks[3], (C, C), minval=-bound, maxval=bound)
    b_gate = jax.random.uniform(ks[4], (C,), minval=-bound, maxval=bound)
    w_mask = jax.random.uniform(ks[5], (C, C), minval=-bound, maxval=bound)
    b_mask = jax.random.uniform(ks[6], (C,), minval=-bound, maxval=bound)

    out = mask_gate(x, w_out, b_out, w_gate, b_gate, w_mask, b_mask)
    out = jax.block_until_ready(out)

    ref = _reference(x, w_out, b_out, w_gate, b_gate, w_mask, b_mask)
    assert out.shape == (N, C, L), out.shape
    assert jnp.allclose(out, ref, atol=1e-5, rtol=1e-5), \
        float(jnp.max(jnp.abs(out - ref)))


if __name__ == "__main__":
    key = jax.random.PRNGKey(0)
    k1, k2, k3 = jax.random.split(key, 3)

    # Small harness shape: L < 128 path (batch-blocked grid step).
    _run_case(k1, N=2, C=4, L=16)
    # 128-aligned L: lane-tiled, pipelined path.
    _run_case(k2, N=2, C=8, L=256)
    # MANNER-like C=60 (C % 8 != 0, exercises Cpad) with ragged last L block.
    _run_case(k3, N=1, C=60, L=200)

    print("KERNEL_OK")
</pallas_src>

<mosaic_0001>
module attributes {stable_mosaic.version = 11 : i64} {
  func.func @_maskgate_kernel(%arg0: i32, %arg1: i32, %arg2: memref<2x4x16xf32, #tpu.memory_space<vmem>>, %arg3: memref<16x4xf32, #tpu.memory_space<vmem>>, %arg4: memref<16x1xf32, #tpu.memory_space<vmem>>, %arg5: memref<4x8xf32, #tpu.memory_space<vmem>>, %arg6: memref<4x1xf32, #tpu.memory_space<vmem>>, %arg7: memref<2x4x16xf32, #tpu.memory_space<vmem>>) attributes {dimension_semantics = [#tpu.dimension_semantics<parallel>, #tpu.dimension_semantics<parallel>], iteration_bounds = array<i64: 1, 1>, scalar_prefetch = 0 : i64, scratch_operands = 0 : i64, tpu.core_type = #tpu.core_type<tc>, window_params = [{transform_indices = @transform_0, window_bounds = array<i64: 2, 4, 16>}, {pipeline_mode = #tpu.pipeline_mode<synchronous>, transform_indices = @transform_1, window_bounds = array<i64: 16, 4>}, {pipeline_mode = #tpu.pipeline_mode<synchronous>, transform_indices = @transform_2, window_bounds = array<i64: 16, 1>}, {pipeline_mode = #tpu.pipeline_mode<synchronous>, transform_indices = @transform_3, window_bounds = array<i64: 4, 8>}, {pipeline_mode = #tpu.pipeline_mode<synchronous>, transform_indices = @transform_4, window_bounds = array<i64: 4, 1>}, {transform_indices = @transform_5, window_bounds = array<i64: 2, 4, 16>}]} {
    %c0 = arith.constant 0 : index
    %c0_0 = arith.constant 0 : index
    %c0_1 = arith.constant 0 : index
    %0 = vector.load %arg2[%c0, %c0_0, %c0_1] : memref<2x4x16xf32, #tpu.memory_space<vmem>>, vector<1x4x16xf32>
    %1 = vector.shape_cast %0 : vector<1x4x16xf32> to vector<4x16xf32>
    %c0_2 = arith.constant 0 : index
    %c0_3 = arith.constant 0 : index
    %2 = vector.load %arg3[%c0_2, %c0_3] : memref<16x4xf32, #tpu.memory_space<vmem>>, vector<16x4xf32>
    %cst = arith.constant dense<0.000000e+00> : vector<16x16xf32>
    %3 = tpu.matmul %2, %1, %cst {dimension_numbers = #tpu.dot_dimension_numbers<[1], [0], [0], [1], [0, 0, 1, 1], [], []>} : vector<16x4xf32>, vector<4x16xf32>, vector<16x16xf32> -> vector<16x16xf32>
    %c0_4 = arith.constant 0 : index
    %c0_5 = arith.constant 0 : index
    %4 = vector.load %arg4[%c0_4, %c0_5] : memref<16x1xf32, #tpu.memory_space<vmem>>, vector<16x1xf32>
    %5 = vector.broadcast %4 : vector<16x1xf32> to vector<16x16xf32>
    %6 = arith.addf %3, %5 : vector<16x16xf32>
    %7 = vector.extract_strided_slice %6 {offsets = [0, 0], sizes = [8, 16], strides = [1, 1]} : vector<16x16xf32> to vector<8x16xf32>
    %8 = math.tanh %7 : vector<8x16xf32>
    %9 = vector.extract_strided_slice %6 {offsets = [8, 0], sizes = [8, 16], strides = [1, 1]} : vector<16x16xf32> to vector<8x16xf32>
    %cst_6 = arith.constant 5.000000e-01 : f32
    %10 = vector.broadcast %cst_6 : f32 to vector<8x16xf32>
    %11 = arith.mulf %10, %9 : vector<8x16xf32>
    %12 = math.tanh %11 : vector<8x16xf32>
    %cst_7 = arith.constant 1.000000e+00 : f32
    %13 = vector.broadcast %cst_7 : f32 to vector<8x16xf32>
    %14 = arith.addf %12, %13 : vector<8x16xf32>
    %cst_8 = arith.constant 5.000000e-01 : f32
    %15 = vector.broadcast %cst_8 : f32 to vector<8x16xf32>
    %16 = arith.mulf %15, %14 : vector<8x16xf32>
    %17 = arith.mulf %8, %16 : vector<8x16xf32>
    %c0_9 = arith.constant 0 : index
    %c0_10 = arith.constant 0 : index
    %18 = vector.load %arg5[%c0_9, %c0_10] : memref<4x8xf32, #tpu.memory_space<vmem>>, vector<4x8xf32>
    %cst_11 = arith.constant dense<0.000000e+00> : vector<4x16xf32>
    %19 = tpu.matmul %18, %17, %cst_11 {dimension_numbers = #tpu.dot_dimension_numbers<[1], [0], [0], [1], [0, 0, 1, 1], [], []>} : vector<4x8xf32>, vector<8x16xf32>, vector<4x16xf32> -> vector<4x16xf32>
    %c0_12 = arith.constant 0 : index
    %c0_13 = arith.constant 0 : index
    %20 = vector.load %arg6[%c0_12, %c0_13] : memref<4x1xf32, #tpu.memory_space<vmem>>, vector<4x1xf32>
    %21 = vector.broadcast %20 : vector<4x1xf32> to vector<4x16xf32>
    %22 = arith.addf %19, %21 : vector<4x16xf32>
    %cst_14 = arith.constant 0.000000e+00 : f32
    %23 = vector.broadcast %cst_14 : f32 to vector<4x16xf32>
    %24 = arith.maximumf %22, %23 : vector<4x16xf32>
    %c0_15 = arith.constant 0 : index
    %c0_16 = arith.constant 0 : index
    %c0_17 = arith.constant 0 : index
    %25 = vector.load %arg7[%c0_15, %c0_16, %c0_17] : memref<2x4x16xf32, #tpu.memory_space<vmem>>, vector<1x4x16xf32>
    %26 = vector.shape_cast %25 : vector<1x4x16xf32> to vector<4x16xf32>
    %27 = vector.shape_cast %24 : vector<4x16xf32> to vector<1x4x16xf32>
    tpu.vector_store %arg7[%c0_15, %c0_16, %c0_17], %27 {strides = array<i32>} : memref<2x4x16xf32, #tpu.memory_space<vmem>>, vector<1x4x16xf32>,
    %c1 = arith.constant 1 : index
    %c0_18 = arith.constant 0 : index
    %c0_19 = arith.constant 0 : index
    %28 = vector.load %arg2[%c1, %c0_18, %c0_19] : memref<2x4x16xf32, #tpu.memory_space<vmem>>, vector<1x4x16xf32>
    %29 = vector.shape_cast %28 : vector<1x4x16xf32> to vector<4x16xf32>
    %c0_20 = arith.constant 0 : index
    %c0_21 = arith.constant 0 : index
    %30 = vector.load %arg3[%c0_20, %c0_21] : memref<16x4xf32, #tpu.memory_space<vmem>>, vector<16x4xf32>
    %cst_22 = arith.constant dense<0.000000e+00> : vector<16x16xf32>
    %31 = tpu.matmul %30, %29, %cst_22 {dimension_numbers = #tpu.dot_dimension_numbers<[1], [0], [0], [1], [0, 0, 1, 1], [], []>} : vector<16x4xf32>, vector<4x16xf32>, vector<16x16xf32> -> vector<16x16xf32>
    %c0_23 = arith.constant 0 : index
    %c0_24 = arith.constant 0 : index
    %32 = vector.load %arg4[%c0_23, %c0_24] : memref<16x1xf32, #tpu.memory_space<vmem>>, vector<16x1xf32>
    %33 = vector.broadcast %32 : vector<16x1xf32> to vector<16x16xf32>
    %34 = arith.addf %31, %33 : vector<16x16xf32>
    %35 = vector.extract_strided_slice %34 {offsets = [0, 0], sizes = [8, 16], strides = [1, 1]} : vector<16x16xf32> to vector<8x16xf32>
    %36 = math.tanh %35 : vector<8x16xf32>
    %37 = vector.extract_strided_slice %34 {offsets = [8, 0], sizes = [8, 16], strides = [1, 1]} : vector<16x16xf32> to vector<8x16xf32>
    %cst_25 = arith.constant 5.000000e-01 : f32
    %38 = vector.broadcast %cst_25 : f32 to vector<8x16xf32>
    %39 = arith.mulf %38, %37 : vector<8x16xf32>
    %40 = math.tanh %39 : vector<8x16xf32>
    %cst_26 = arith.constant 1.000000e+00 : f32
    %41 = vector.broadcast %cst_26 : f32 to vector<8x16xf32>
    %42 = arith.addf %40, %41 : vector<8x16xf32>
    %cst_27 = arith.constant 5.000000e-01 : f32
    %43 = vector.broadcast %cst_27 : f32 to vector<8x16xf32>
    %44 = arith.mulf %43, %42 : vector<8x16xf32>
    %45 = arith.mulf %36, %44 : vector<8x16xf32>
    %c0_28 = arith.constant 0 : index
    %c0_29 = arith.constant 0 : index
    %46 = vector.load %arg5[%c0_28, %c0_29] : memref<4x8xf32, #tpu.memory_space<vmem>>, vector<4x8xf32>
    %cst_30 = arith.constant dense<0.000000e+00> : vector<4x16xf32>
    %47 = tpu.matmul %46, %45, %cst_30 {dimension_numbers = #tpu.dot_dimension_numbers<[1], [0], [0], [1], [0, 0, 1, 1], [], []>} : vector<4x8xf32>, vector<8x16xf32>, vector<4x16xf32> -> vector<4x16xf32>
    %c0_31 = arith.constant 0 : index
    %c0_32 = arith.constant 0 : index
    %48 = vector.load %arg6[%c0_31, %c0_32] : memref<4x1xf32, #tpu.memory_space<vmem>>, vector<4x1xf32>
    %49 = vector.broadcast %48 : vector<4x1xf32> to vector<4x16xf32>
    %50 = arith.addf %47, %49 : vector<4x16xf32>
    %cst_33 = arith.constant 0.000000e+00 : f32
    %51 = vector.broadcast %cst_33 : f32 to vector<4x16xf32>
    %52 = arith.maximumf %50, %51 : vector<4x16xf32>
    %c1_34 = arith.constant 1 : index
    %c0_35 = arith.constant 0 : index
    %c0_36 = arith.constant 0 : index
    %53 = vector.load %arg7[%c1_34, %c0_35, %c0_36] : memref<2x4x16xf32, #tpu.memory_space<vmem>>, vector<1x4x16xf32>
    %54 = vector.shape_cast %53 : vector<1x4x16xf32> to vector<4x16xf32>
    %55 = vector.shape_cast %52 : vector<4x16xf32> to vector<1x4x16xf32>
    tpu.vector_store %arg7[%c1_34, %c0_35, %c0_36], %55 {strides = array<i32>} : memref<2x4x16xf32, #tpu.memory_space<vmem>>, vector<1x4x16xf32>,
    return
  }
  func.func @transform_0(%arg0: i32, %arg1: i32) -> (i32, i32, i32) {
    %c0_i32 = arith.constant 0 : i32
    %c0_i32_0 = arith.constant 0 : i32
    return %arg0, %c0_i32, %arg1 : i32, i32, i32
  }
  func.func @transform_1(%arg0: i32, %arg1: i32) -> (i32, i32) {
    %c0_i32 = arith.constant 0 : i32
    %c0_i32_0 = arith.constant 0 : i32
    %c0_i32_1 = arith.constant 0 : i32
    return %c0_i32, %c0_i32_0 : i32, i32
  }
  func.func @transform_2(%arg0: i32, %arg1: i32) -> (i32, i32) {
    %c0_i32 = arith.constant 0 : i32
    %c0_i32_0 = arith.constant 0 : i32
    %c0_i32_1 = arith.constant 0 : i32
    return %c0_i32, %c0_i32_0 : i32, i32
  }
  func.func @transform_3(%arg0: i32, %arg1: i32) -> (i32, i32) {
    %c0_i32 = arith.constant 0 : i32
    %c0_i32_0 = arith.constant 0 : i32
    %c0_i32_1 = arith.constant 0 : i32
    return %c0_i32, %c0_i32_0 : i32, i32
  }
  func.func @transform_4(%arg0: i32, %arg1: i32) -> (i32, i32) {
    %c0_i32 = arith.constant 0 : i32
    %c0_i32_0 = arith.constant 0 : i32
    %c0_i32_1 = arith.constant 0 : i32
    return %c0_i32, %c0_i32_0 : i32, i32
  }
  func.func @transform_5(%arg0: i32, %arg1: i32) -> (i32, i32, i32) {
    %c0_i32 = arith.constant 0 : i32
    %c0_i32_0 = arith.constant 0 : i32
    return %arg0, %c0_i32, %arg1 : i32, i32, i32
  }
}

</mosaic_0001>

<bundles_post_ra>
// kernel: tpu_custom_call.1
= control target key start
LH: loop header
LB: loop body
LE: loop exit
PB: predicated region body
PF: predicated region fallthrough
CT: control target
= control target key end

     0   :  { %vm43_vm0 = vcmask 1043456   ;;  %vm36_vm1 = vcmask 31744   ;;  %v494_v4 = vmov 0   ;;  %s569_s0 = inlined_call_operand.vmem [shape: f32[2,4,16], index: 0, kind: input, shape index: {}]   ;;  %s570_s1 = inlined_call_operand.vmem [shape: f32[16,4], index: 1, kind: input, shape index: {}]   ;;  %s571_s2 = inlined_call_operand.vmem [shape: f32[16,1], index: 2, kind: input, shape index: {}]   ;;  %s572_s3 = inlined_call_operand.vmem [shape: f32[4,8], index: 3, kind: input, shape index: {}]   ;;  %s573_s4 = inlined_call_operand.vmem [shape: f32[4,1], index: 4, kind: input, shape index: {}]   ;;  %s574_s5 = inlined_call_operand.hbm [shape: f32[2,4,16], index: 5, kind: output, shape index: {}]  }
   0x1   :  { %v21_v0 = vld [vmem:[%s569_s0] sm:$0xf]  ;;  %v23_v2 = vld [vmem:[%s570_s1 + $0x8] sm:$0xff]  ;;  %v421_v3 = vld [vmem:[%s569_s0 + $0x4] sm:$0xf]  ;;  %462 = vset.pattern.permute.xlu0 %v494_v4 }
   0x2   :  { %v22_v1 = vld [vmem:[%s570_s1] sm:$0xff]  ;;  %436 = vmatprep.subr.msk.mxu0 %vm43_vm0, %v21_v0  ;;  %v25_v5 = vld [vmem:[%s571_s2 + $0x8] sm:$0xff] }
   0x3   :  { %438 = vmatprep.mubr.msk.f32.mxu0 %vm36_vm1, %v22_v1  ;;  %437 = vmatpush3.msk.msra.mxu0 %vm43_vm0, %v21_v0 }
   0x4   :  { %10 = vsyncpa [#allocation3], 0  ;;  %439 = vmatmul.mubr.msk.f32.vlgmr.msra.gmra.mxu0 %vm36_vm1, %v23_v2  ;;  %446 = vmatprep.subr.msk.mxu0 %vm43_vm0, %v421_v3  ;;  %v24_v6 = vld [vmem:[%s571_s2] sm:$0xff]  ;;  %v495_v9 = vmov 0.0   ;;  %vm496_vm2 = vmmov 0   ;;  %vm135_vm3 = vcmask 64512  }
   0x5   :  { %447 = vmatpush3.msk.msra.mxu0 %vm43_vm0, %v421_v3  ;;  %448 = vmatprep.mubr.msk.f32.mxu0 %vm36_vm1, %v22_v1  ;;  %v129_v7 = vld [vmem:[%s573_s4] sm:$0xf]  ;;  %vm210_vm4 = vcmask 125952   ;;  %s497_s9 = smov [#allocation2]  }
   0x6   :  { %33 = vperm.xlu0 %462, %v25_v5   ;;  %463 = vset.pattern.permute.xlu1 %v494_v4  ;;  %v319_v8 = vld [vmem:[%s573_s4] sm:$0xf]  ;;  %s406_s10 = sshll.u32 %s497_s9, 4  ;;  %s407_s10 = int_to_ptr.vmem [resolvable:$true] %s406_s10 }
   0x7   :  { %28 = vperm.xlu1 %463, %v24_v6   ;;  %441 = vmatprep.subr.mxu1 %v495_v9  ;;  %v128_v31 = vld [vmem:[%s572_s3] sm:$0xf]  ;;  %s472_s11 = scalar_lea.vmem %s407_s10, 128  ;;  %p477_p1 = scmp.lt.s32.totalorder %s407_s10, %s407_s10 }
   0x8   :  { %449 = vmatmul.mubr.msk.f32.vlgmr.msra.gmra.mxu0 %vm36_vm1, %v23_v2  ;;  %443 = vmatprep.mubr.msk.f32.mxu1 %vm496_vm2, %v495_v9  ;;  %v318_v35 = vld [vmem:[%s572_s3] sm:$0xf]  ;;  %p473_p0 = scmp.ne.s32.totalorder %s407_s10, %s472_s11  ;;  %p478_p2 = scmp.lt.s32.totalorder %s472_s11, %s472_s11 }
   0xa   :  { %225 = vperm.xlu0 %462, %v25_v5   ;;  %p479_p3 = por %p478_p2, %p477_p1 }
   0xb   :  { %220 = vperm.xlu1 %463, %v24_v6  }
   0xc   :  { %p480_p4 = pnand %p479_p3, %p473_p0 }
   0xe   :  { %132 = vperm.xlu0 %462, %v129_v7  }
   0xf   :  { %322 = vperm.xlu1 %463, %v319_v8  }
  0x81   :  { %v34_v10 = vpop.permute.xlu0 %33 }
  0x82   :  { %v29_v13 = vpop.permute.xlu1 %28 }
  0x85   :  { %v226_v16 = vpop.permute.xlu0 %225 }
  0x86   :  { %v221_v22 = vpop.permute.xlu1 %220 }
  0x89   :  { %v133_v36 = vpop.permute.xlu0 %132 }
  0x8a   :  { %v323_v41 = vpop.permute.xlu1 %322 }
  0xc4   :  { %v440_v11 = vpop.f32.mrf.mxu0 }
  0xc5   :  { %v119_v12 = vadd.f32 %v440_v11, %v34_v10 }
  0xc6   :  { %v113_v14 = vpop.f32.mrf.mxu0 }
  0xc7   :  { %v123_v15 = vmul.f32 0.5, %v119_v12  ;;  %v114_v17 = vadd.f32 %v113_v14, %v29_v13 }
  0xc8   :  { %v450_v18 = vpop.f32.mrf.mxu0 }
  0xc9   :  { %464 = vtanh.f32 %v123_v15  ;;  %v309_v19 = vadd.f32 %v450_v18, %v226_v16 }
  0xca   :  { %v303_v20 = vpop.f32.mrf.mxu0  ;;  %466 = vtanh.f32 %v114_v17 }
  0xcb   :  { %v313_v21 = vmul.f32 0.5, %v309_v19  ;;  %v304_v23 = vadd.f32 %v303_v20, %v221_v22 }
  0xcd   :  { %468 = vtanh.f32 %v313_v21 }
  0xce   :  { %470 = vtanh.f32 %v304_v23 }
  0xd6   :  { %v465_v24 = vpop.eup %464 }
  0xd7   :  { %v125_v25 = vadd.f32 1.0, %v465_v24  ;;  %v467_v26 = vpop.eup %466 }
  0xd9   :  { %v126_v27 = vmul.f32 0.5, %v125_v25 }
  0xda   :  { %v469_v28 = vpop.eup %468 }
  0xdb   :  { %v315_v29 = vadd.f32 1.0, %v469_v28  ;;  %v127_v30 = vmul.f32 %v467_v26, %v126_v27  ;;  %v471_v33 = vpop.eup %470 }
  0xdd   :  { %v316_v32 = vmul.f32 0.5, %v315_v29  ;;  %442 = vmatpush3.msra.mxu1 %v127_v30 }
  0xde   :  { %444 = vmatmul.mubr.msk.f32.vlgmr.msra.gmra.mxu1 %vm135_vm3, %v128_v31  ;;  %451 = vmatprep.subr.mxu1 %v495_v9 }
  0xdf   :  { %v317_v34 = vmul.f32 %v471_v33, %v316_v32  ;;  %453 = vmatprep.mubr.msk.f32.mxu1 %vm496_vm2, %v495_v9 }
  0xe1   :  { %452 = vmatpush3.msra.mxu1 %v317_v34 }
  0xe2   :  { %454 = vmatmul.mubr.msk.f32.vlgmr.msra.gmra.mxu1 %vm135_vm3, %v318_v35 }
 0x19e   :  { %v205_v37 = vpop.f32.mrf.mxu1 }
 0x19f   :  { %v206_v38 = vadd.f32 %v205_v37, %v133_v36 }
 0x1a0   :  { %v445_v39 = vpop.f32.mrf.mxu1 }
 0x1a1   :  { %v209_v40 = vmax.f32 %v206_v38, 0.0 }
 0x1a2   :  { %v394_v42 = vpop.f32.mrf.mxu1 }
 0x1a3   :  { %211 = vst.msk [vmem:[#allocation2] sm:$0xf] %vm210_vm4, %v209_v40  ;;  %v395_v43 = vadd.f32 %v394_v42, %v323_v41 }
 0x1a4   :  { %v455_v44 = vpop.f32.mrf.mxu1 }
 0x1a5   :  { %v398_v45 = vmax.f32 %v395_v43, 0.0 }
 0x1a7   :  { %400 = vst.msk [vmem:[#allocation2 + $0x4] sm:$0xf] %vm210_vm4, %v398_v45 }
 0x1a8   :  { %483 = shalt.err (!%p480_p4)
}
 0x1a9   :  { %s498_s3 = smov 64   ;;  %s499_s12 = smov 4  }
 0x1aa   :  { %412 = dma.vmem_to_hbm [thread:$0]  %s407_s10, 128, %s574_s5, [#allocation3], %s498_s3, %s498_s3, %s499_s12  }
 0x1ab   :  { %492 = dma.done.wait [#allocation3], 128  }
 0x1ac   :  { %493 = vsyncadd [#allocation3], 4294967168 }
 0x1ad   :  { %416 = vsyncpa [#allocation3], 1 }

</bundles_post_ra>
